<compile_context>
chip_gen: v5e
topology: v5e:2x2
jax: 0.10.0
libtpu: 0.0.40
codegen_flags: <defaults>
</compile_context>

<pallas_src>
import jax
import jax.numpy as jnp
from jax.experimental import pallas as pl
from jax.experimental.pallas import tpu as pltpu


# ----------------------------------------------------------------------------
# Kernel 1: concat + 1x1 conv (BN-scale pre-folded) + bias + ReLU + pool-sum.
# grid = (N, n_par, n_inner); innermost axis is the pool-reduction axis.
# ----------------------------------------------------------------------------
def _convbnrelu_pool_kernel(sp_ref, cp_ref, w_sp_ref, w_cp_ref, bias_ref,
                            feat_ref, pool_ref):
    j = pl.program_id(2)

    # 1x1 conv on concat([sp, cp], channel) == sp @ W[:C_sp] + cp @ W[C_sp:]
    # bf16 operands, f32 MXU accumulation.
    conv = (jnp.dot(sp_ref[0], w_sp_ref[...], preferred_element_type=jnp.float32)
            + jnp.dot(cp_ref[0], w_cp_ref[...], preferred_element_type=jnp.float32))

    feat = jnp.maximum(conv + bias_ref[...], 0.0)        # (tile_m, c_out) f32
    feat_ref[0] = feat.astype(feat_ref.dtype)            # bf16 store (lane-dense)

    # accumulate spatial sum for the global average pool (f32, from pre-cast feat)
    @pl.when(j == 0)
    def _():
        pool_ref[...] = jnp.zeros(pool_ref.shape, pool_ref.dtype)

    psum = jnp.sum(feat, axis=0, keepdims=True)          # (1, c_out)
    pool_ref[...] = pool_ref[...] + psum[None, None]     # (1, 1, 1, c_out)


# ----------------------------------------------------------------------------
# Kernel 2: out = feat * (attn + 1)   (attention already computed per batch).
# ----------------------------------------------------------------------------
def _apply_attention_kernel(attn_ref, feat_ref, out_ref):
    # attn_ref holds (sigmoid(mlp(pool)) + 1): (1, 1, c_out) f32.
    feat = feat_ref[0].astype(jnp.float32)               # f32 elementwise (v5e-safe)
    out_ref[0] = (feat * attn_ref[0]).astype(out_ref.dtype)


# ----------------------------------------------------------------------------
# Tiling helpers
# ----------------------------------------------------------------------------
def _pick_tile_m(hw, want):
    """Largest tile <= want that divides hw and is sublane-aligned (or == hw)."""
    tm = min(want, hw)
    while hw % tm != 0 or (tm != hw and tm % 8 != 0):
        tm -= 1
    return max(tm, 1)


# ----------------------------------------------------------------------------
# Channels-last entry point: sp, cp are (N, H*W, C). Preferred in a
# channels-last model (no transpose passes).
# ----------------------------------------------------------------------------
def feature_fusion_forward_nhwc(sp, cp, params, *, tile_m=512):
    N, HW, c_sp = sp.shape
    c_cp = cp.shape[2]

    w_conv = params["w_convblk"].astype(jnp.float32)     # (C_in, C_out)
    c_in, c_out = w_conv.shape
    assert c_in == c_sp + c_cp
    w1 = params["w1"].astype(jnp.float32)                # (C_out, C_out//4)
    w2 = params["w2"].astype(jnp.float32)                # (C_out//4, C_out)

    # Fold eval-mode BN scale into the conv weights; keep only the bias.
    eps = 1e-5
    scale = params["bn_gamma"] / jnp.sqrt(params["bn_var"] + eps)        # (C_out,)
    bias = (params["bn_beta"] - params["bn_mean"] * scale).reshape(1, c_out)
    w_folded = w_conv * scale[None, :]
    w_sp = w_folded[:c_sp].astype(jnp.bfloat16)          # (C_sp, C_out)
    w_cp = w_folded[c_sp:].astype(jnp.bfloat16)          # (C_cp, C_out)

    sp = sp.astype(jnp.bfloat16)
    cp = cp.astype(jnp.bfloat16)
    bias = bias.astype(jnp.float32)

    tile_m = _pick_tile_m(HW, tile_m)
    n_tiles = HW // tile_m
    # Give v7x megacore a parallel axis of extent >= 2 even when N == 1;
    # each parallel slice gets its own partial-pool block (no shared accumulator
    # across a parallel axis).
    n_par = 2 if n_tiles % 2 == 0 else 1
    n_inner = n_tiles // n_par

    def row_map(n, p, j):
        return (n, p * n_inner + j, 0)

    feat, pool_partial = pl.pallas_call(
        _convbnrelu_pool_kernel,
        out_shape=(
            jax.ShapeDtypeStruct((N, HW, c_out), jnp.bfloat16),
            jax.ShapeDtypeStruct((N, n_par, 1, c_out), jnp.float32),
        ),
        grid_spec=pltpu.PrefetchScalarGridSpec(
            num_scalar_prefetch=0,
            grid=(N, n_par, n_inner),
            in_specs=[
                pl.BlockSpec((1, tile_m, c_sp), row_map),
                pl.BlockSpec((1, tile_m, c_cp), row_map),
                pl.BlockSpec((c_sp, c_out), lambda n, p, j: (0, 0)),
                pl.BlockSpec((c_cp, c_out), lambda n, p, j: (0, 0)),
                pl.BlockSpec((1, c_out), lambda n, p, j: (0, 0)),
            ],
            out_specs=[
                pl.BlockSpec((1, tile_m, c_out), row_map),
                pl.BlockSpec((1, 1, 1, c_out), lambda n, p, j: (n, p, 0, 0)),
            ],
        ),
        compiler_params=pltpu.CompilerParams(
            dimension_semantics=("parallel", "parallel", "arbitrary")),
    )(sp, cp, w_sp, w_cp, bias)

    # Attention MLP hoisted out of the streaming kernel: once per batch element,
    # tiny matmuls in plain JAX (f32). Precompute (attn + 1) so kernel 2 is a
    # single multiply: feat*attn + feat == feat*(attn + 1).
    pooled = pool_partial.reshape(N, n_par, c_out).sum(axis=1) * (1.0 / float(HW))
    h = jnp.maximum(pooled @ w1, 0.0)
    attn_plus_1 = (jax.nn.sigmoid(h @ w2) + 1.0).reshape(N, 1, c_out).astype(jnp.float32)

    out = pl.pallas_call(
        _apply_attention_kernel,
        out_shape=jax.ShapeDtypeStruct((N, HW, c_out), jnp.bfloat16),
        grid_spec=pltpu.PrefetchScalarGridSpec(
            num_scalar_prefetch=0,
            grid=(N, n_tiles),
            in_specs=[
                pl.BlockSpec((1, 1, c_out), lambda n, j: (n, 0, 0)),
                pl.BlockSpec((1, tile_m, c_out), lambda n, j: (n, j, 0)),
            ],
            out_specs=pl.BlockSpec((1, tile_m, c_out), lambda n, j: (n, j, 0)),
        ),
        compiler_params=pltpu.CompilerParams(
            dimension_semantics=("parallel", "parallel")),
        input_output_aliases={1: 0},          # overwrite feat in place
    )(attn_plus_1, feat)

    return out                                # (N, HW, c_out) bf16


# ----------------------------------------------------------------------------
# NCHW wrapper (matches the PyTorch module interface). The transposes are done
# in bf16 (half the HBM traffic); for a channels-last model call the _nhwc
# entry point directly and skip these layout passes.
# ----------------------------------------------------------------------------
def feature_fusion_forward(sp_nchw, cp_nchw, params, *, tile_m=512):
    N, c_sp, H, W = sp_nchw.shape
    c_cp = cp_nchw.shape[1]
    HW = H * W
    sp = jnp.transpose(sp_nchw.astype(jnp.bfloat16), (0, 2, 3, 1)).reshape(N, HW, c_sp)
    cp = jnp.transpose(cp_nchw.astype(jnp.bfloat16), (0, 2, 3, 1)).reshape(N, HW, c_cp)
    out = feature_fusion_forward_nhwc(sp, cp, params, tile_m=tile_m)
    c_out = out.shape[-1]
    out = jnp.transpose(out.reshape(N, H, W, c_out), (0, 3, 1, 2))
    return out.astype(sp_nchw.dtype)


# ----------------------------------------------------------------------------
# Deterministic parameter init (kaiming_normal_ with a=1 -> std = 1/sqrt(fan_in))
# ----------------------------------------------------------------------------
def init_params(key, c_in, c_out):
    c_mid = c_out // 4
    k0, k1, k2 = jax.random.split(key, 3)
    return {
        # convblk 1x1 conv weight, stored as (C_in, C_out) for channel matmul
        "w_convblk": jax.random.normal(k0, (c_in, c_out), jnp.float32) / jnp.sqrt(c_in),
        # BatchNorm2d(C_out) running stats / affine (eval mode)
        "bn_gamma": jnp.ones((c_out,), jnp.float32),
        "bn_beta": jnp.zeros((c_out,), jnp.float32),
        "bn_mean": jnp.zeros((c_out,), jnp.float32),
        "bn_var": jnp.ones((c_out,), jnp.float32),
        # attention 1x1 convs stored as (in, out)
        "w1": jax.random.normal(k1, (c_out, c_mid), jnp.float32) / jnp.sqrt(c_out),
        "w2": jax.random.normal(k2, (c_mid, c_out), jnp.float32) / jnp.sqrt(c_mid),
    }


# Pure-JAX f32 reference for sanity checking.
def reference_forward(sp, cp, p):
    x = jnp.concatenate([sp, cp], axis=1)                    # NCHW
    conv = jnp.einsum("nihw,io->nohw", x, p["w_convblk"])
    eps = 1e-5
    scale = p["bn_gamma"] / jnp.sqrt(p["bn_var"] + eps)
    bias = p["bn_beta"] - p["bn_mean"] * scale
    feat = jnp.maximum(conv * scale[None, :, None, None] +
                       bias[None, :, None, None], 0.0)
    att = jnp.mean(feat, axis=(2, 3))                        # global avg pool
    h = jnp.maximum(att @ p["w1"], 0.0)
    a = jax.nn.sigmoid(h @ p["w2"])
    return feat * a[:, :, None, None] + feat


if __name__ == "__main__":
    # Small shapes: spatial-path feats (2, 2, 16, 16), context-path feats (2, 2, 16, 16)
    # -> channels_in = 4, channels_out = 8 (so channels_out // 4 = 2).
    N, C_SP, C_CP, H, W = 2, 2, 2, 16, 16
    C_IN, C_OUT = C_SP + C_CP, 8

    key = jax.random.PRNGKey(0)
    k_sp, k_cp, k_par = jax.random.split(key, 3)
    sp = jax.random.normal(k_sp, (N, C_SP, H, W), jnp.float32)
    cp = jax.random.normal(k_cp, (N, C_CP, H, W), jnp.float32)
    params = init_params(k_par, C_IN, C_OUT)

    out = feature_fusion_forward(sp, cp, params, tile_m=512)
    out = jax.block_until_ready(out)

    ref = reference_forward(sp, cp, params)
    assert out.shape == (N, C_OUT, H, W), out.shape
    # bf16 streaming path -> loosened tolerance vs f32 reference.
    assert jnp.allclose(out, ref, atol=5e-2, rtol=5e-2), float(
        jnp.max(jnp.abs(out - ref)))

    print("KERNEL_OK")
</pallas_src>

<mosaic_0001>
module attributes {stable_mosaic.version = 11 : i64} {
  func.func @_convbnrelu_pool_kernel(%arg0: i32, %arg1: i32, %arg2: i32, %arg3: memref<1x256x2xbf16, #tpu.memory_space<vmem>>, %arg4: memref<1x256x2xbf16, #tpu.memory_space<vmem>>, %arg5: memref<2x8xbf16, #tpu.memory_space<vmem>>, %arg6: memref<2x8xbf16, #tpu.memory_space<vmem>>, %arg7: memref<1x8xf32, #tpu.memory_space<vmem>>, %arg8: memref<1x256x8xbf16, #tpu.memory_space<vmem>>, %arg9: memref<1x1x1x8xf32, #tpu.memory_space<vmem>>) attributes {dimension_semantics = [#tpu.dimension_semantics<parallel>, #tpu.dimension_semantics<parallel>, #tpu.dimension_semantics<arbitrary>], iteration_bounds = array<i64: 2, 1, 1>, scalar_prefetch = 0 : i64, scratch_operands = 0 : i64, tpu.core_type = #tpu.core_type<tc>, window_params = [{transform_indices = @transform_0, window_bounds = array<i64: 1, 256, 2>}, {transform_indices = @transform_1, window_bounds = array<i64: 1, 256, 2>}, {pipeline_mode = #tpu.pipeline_mode<synchronous>, transform_indices = @transform_2, window_bounds = array<i64: 2, 8>}, {pipeline_mode = #tpu.pipeline_mode<synchronous>, transform_indices = @transform_3, window_bounds = array<i64: 2, 8>}, {pipeline_mode = #tpu.pipeline_mode<synchronous>, transform_indices = @transform_4, window_bounds = array<i64: 1, 8>}, {transform_indices = @transform_5, window_bounds = array<i64: 1, 256, 8>}, {transform_indices = @transform_6, window_bounds = array<i64: 1, 1, 1, 8>}]} {
    %c0 = arith.constant 0 : index
    %c0_0 = arith.constant 0 : index
    %c0_1 = arith.constant 0 : index
    %0 = vector.load %arg3[%c0, %c0_0, %c0_1] : memref<1x256x2xbf16, #tpu.memory_space<vmem>>, vector<1x256x2xbf16>
    %1 = vector.shape_cast %0 : vector<1x256x2xbf16> to vector<256x2xbf16>
    %c0_2 = arith.constant 0 : index
    %c0_3 = arith.constant 0 : index
    %2 = vector.load %arg5[%c0_2, %c0_3] : memref<2x8xbf16, #tpu.memory_space<vmem>>, vector<2x8xbf16>
    %cst = arith.constant dense<0.000000e+00> : vector<256x8xf32>
    %3 = tpu.matmul %1, %2, %cst {dimension_numbers = #tpu.dot_dimension_numbers<[1], [0], [0], [1], [0, 0, 1, 1], [], []>} : vector<256x2xbf16>, vector<2x8xbf16>, vector<256x8xf32> -> vector<256x8xf32>
    %c0_4 = arith.constant 0 : index
    %c0_5 = arith.constant 0 : index
    %c0_6 = arith.constant 0 : index
    %4 = vector.load %arg4[%c0_4, %c0_5, %c0_6] : memref<1x256x2xbf16, #tpu.memory_space<vmem>>, vector<1x256x2xbf16>
    %5 = vector.shape_cast %4 : vector<1x256x2xbf16> to vector<256x2xbf16>
    %c0_7 = arith.constant 0 : index
    %c0_8 = arith.constant 0 : index
    %6 = vector.load %arg6[%c0_7, %c0_8] : memref<2x8xbf16, #tpu.memory_space<vmem>>, vector<2x8xbf16>
    %cst_9 = arith.constant dense<0.000000e+00> : vector<256x8xf32>
    %7 = tpu.matmul %5, %6, %cst_9 {dimension_numbers = #tpu.dot_dimension_numbers<[1], [0], [0], [1], [0, 0, 1, 1], [], []>} : vector<256x2xbf16>, vector<2x8xbf16>, vector<256x8xf32> -> vector<256x8xf32>
    %8 = arith.addf %3, %7 : vector<256x8xf32>
    %c0_10 = arith.constant 0 : index
    %c0_11 = arith.constant 0 : index
    %9 = vector.load %arg7[%c0_10, %c0_11] : memref<1x8xf32, #tpu.memory_space<vmem>>, vector<1x8xf32>
    %10 = vector.broadcast %9 : vector<1x8xf32> to vector<256x8xf32>
    %11 = arith.addf %8, %10 : vector<256x8xf32>
    %cst_12 = arith.constant 0.000000e+00 : f32
    %12 = vector.broadcast %cst_12 : f32 to vector<256x8xf32>
    %13 = arith.maximumf %11, %12 : vector<256x8xf32>
    %14 = arith.truncf %13 : vector<256x8xf32> to vector<256x8xbf16>
    %c0_13 = arith.constant 0 : index
    %c0_14 = arith.constant 0 : index
    %c0_15 = arith.constant 0 : index
    %15 = vector.load %arg8[%c0_13, %c0_14, %c0_15] : memref<1x256x8xbf16, #tpu.memory_space<vmem>>, vector<1x256x8xbf16>
    %16 = vector.shape_cast %15 : vector<1x256x8xbf16> to vector<256x8xbf16>
    %17 = vector.shape_cast %14 : vector<256x8xbf16> to vector<1x256x8xbf16>
    tpu.vector_store %arg8[%c0_13, %c0_14, %c0_15], %17 {strides = array<i32>} : memref<1x256x8xbf16, #tpu.memory_space<vmem>>, vector<1x256x8xbf16>,
    %c0_i32 = arith.constant 0 : i32
    %18 = arith.cmpi eq, %arg2, %c0_i32 : i32
    %19 = arith.extui %18 : i1 to i32
    %c0_i32_16 = arith.constant 0 : i32
    %20 = arith.cmpi ne, %19, %c0_i32_16 : i32
    scf.if %20 {
      %cst_26 = arith.constant 0.000000e+00 : f32
      %27 = vector.broadcast %cst_26 : f32 to vector<1x1x1x8xf32>
      %c0_27 = arith.constant 0 : index
      %c0_28 = arith.constant 0 : index
      %c0_29 = arith.constant 0 : index
      %c0_30 = arith.constant 0 : index
      %28 = vector.load %arg9[%c0_27, %c0_28, %c0_29, %c0_30] : memref<1x1x1x8xf32, #tpu.memory_space<vmem>>, vector<1x1x1x8xf32>
      tpu.vector_store %arg9[%c0_27, %c0_28, %c0_29, %c0_30], %27 {strides = array<i32>} : memref<1x1x1x8xf32, #tpu.memory_space<vmem>>, vector<1x1x1x8xf32>,
    } else {
    }
    %cst_17 = arith.constant dense<0.000000e+00> : vector<8xf32>
    %21 = vector.multi_reduction <add>, %13, %cst_17 [0] : vector<256x8xf32> to vector<8xf32>
    %22 = vector.shape_cast %21 : vector<8xf32> to vector<1x8xf32>
    %c0_18 = arith.constant 0 : index
    %c0_19 = arith.constant 0 : index
    %c0_20 = arith.constant 0 : index
    %c0_21 = arith.constant 0 : index
    %23 = vector.load %arg9[%c0_18, %c0_19, %c0_20, %c0_21] : memref<1x1x1x8xf32, #tpu.memory_space<vmem>>, vector<1x1x1x8xf32>
    %24 = vector.shape_cast %22 : vector<1x8xf32> to vector<1x1x1x8xf32>
    %25 = arith.addf %23, %24 : vector<1x1x1x8xf32>
    %c0_22 = arith.constant 0 : index
    %c0_23 = arith.constant 0 : index
    %c0_24 = arith.constant 0 : index
    %c0_25 = arith.constant 0 : index
    %26 = vector.load %arg9[%c0_22, %c0_23, %c0_24, %c0_25] : memref<1x1x1x8xf32, #tpu.memory_space<vmem>>, vector<1x1x1x8xf32>
    tpu.vector_store %arg9[%c0_22, %c0_23, %c0_24, %c0_25], %25 {strides = array<i32>} : memref<1x1x1x8xf32, #tpu.memory_space<vmem>>, vector<1x1x1x8xf32>,
    return
  }
  func.func @transform_0(%arg0: i32, %arg1: i32, %arg2: i32) -> (i32, i32, i32) {
    %c1_i32 = arith.constant 1 : i32
    %0 = arith.muli %arg1, %c1_i32 : i32
    %1 = arith.addi %0, %arg2 : i32
    %c0_i32 = arith.constant 0 : i32
    %c0_i32_0 = arith.constant 0 : i32
    return %arg0, %1, %c0_i32 : i32, i32, i32
  }
  func.func @transform_1(%arg0: i32, %arg1: i32, %arg2: i32) -> (i32, i32, i32) {
    %c1_i32 = arith.constant 1 : i32
    %0 = arith.muli %arg1, %c1_i32 : i32
    %1 = arith.addi %0, %arg2 : i32
    %c0_i32 = arith.constant 0 : i32
    %c0_i32_0 = arith.constant 0 : i32
    return %arg0, %1, %c0_i32 : i32, i32, i32
  }
  func.func @transform_2(%arg0: i32, %arg1: i32, %arg2: i32) -> (i32, i32) {
    %c0_i32 = arith.constant 0 : i32
    %c0_i32_0 = arith.constant 0 : i32
    %c0_i32_1 = arith.constant 0 : i32
    return %c0_i32, %c0_i32_0 : i32, i32
  }
  func.func @transform_3(%arg0: i32, %arg1: i32, %arg2: i32) -> (i32, i32) {
    %c0_i32 = arith.constant 0 : i32
    %c0_i32_0 = arith.constant 0 : i32
    %c0_i32_1 = arith.constant 0 : i32
    return %c0_i32, %c0_i32_0 : i32, i32
  }
  func.func @transform_4(%arg0: i32, %arg1: i32, %arg2: i32) -> (i32, i32) {
    %c0_i32 = arith.constant 0 : i32
    %c0_i32_0 = arith.constant 0 : i32
    %c0_i32_1 = arith.constant 0 : i32
    return %c0_i32, %c0_i32_0 : i32, i32
  }
  func.func @transform_5(%arg0: i32, %arg1: i32, %arg2: i32) -> (i32, i32, i32) {
    %c1_i32 = arith.constant 1 : i32
    %0 = arith.muli %arg1, %c1_i32 : i32
    %1 = arith.addi %0, %arg2 : i32
    %c0_i32 = arith.constant 0 : i32
    %c0_i32_0 = arith.constant 0 : i32
    return %arg0, %1, %c0_i32 : i32, i32, i32
  }
  func.func @transform_6(%arg0: i32, %arg1: i32, %arg2: i32) -> (i32, i32, i32, i32) {
    %c0_i32 = arith.constant 0 : i32
    %c0_i32_0 = arith.constant 0 : i32
    %c0_i32_1 = arith.constant 0 : i32
    return %arg0, %arg1, %c0_i32, %c0_i32_0 : i32, i32, i32, i32
  }
}

</mosaic_0001>

<bundles_post_ra>
// kernel: tpu_custom_call.1
= control target key start
LH: loop header
LB: loop body
LE: loop exit
PB: predicated region body
PF: predicated region fallthrough
CT: control target
= control target key end

     0   :  { %12 = vsyncpa [#allocation3], 0  ;;  %s2060_s0 = inlined_call_operand.vmem [shape: bf16[2,256,2], index: 0, kind: input, shape index: {}]   ;;  %s2061_s1 = inlined_call_operand.vmem [shape: bf16[2,256,2], index: 1, kind: input, shape index: {}]   ;;  %s2062_s2 = inlined_call_operand.vmem [shape: bf16[2,8], index: 2, kind: input, shape index: {}]   ;;  %s2063_s3 = inlined_call_operand.vmem [shape: bf16[2,8], index: 3, kind: input, shape index: {}]   ;;  %s2064_s4 = inlined_call_operand.vmem [shape: f32[1,8], index: 4, kind: input, shape index: {}]   ;;  %s2065_s5 = inlined_call_operand.vmem [shape: bf16[2,256,8], index: 5, kind: output, shape index: {0}]   ;;  %s2066_s6 = inlined_call_operand.hbm [shape: f32[2,1,1,8], index: 6, kind: output, shape index: {1}]  }
   0x1   :  { %14 = vsyncpa [#allocation3 + $0x1], 0  ;;  %s1628_s21 = smov 0   ;;  %s1630_s22 = smov 0  }
   0x2   :  { %s1632_s23 = smov 0   ;;  %s1634_s24 = smov 0  }
   0x3   :  { %s1636_s25 = smov 0   ;;  %s1638_s26 = smov 0  }
   0x4 LB: > { %s1245_s27 = sadd.s32 4294967295, %s1590_s26   ;;  %s1246_s28 = sadd.s32 4294967294, %s1590_s26   ;;  %s1590_s26 = sphi %s1638_s26, %s20_s26   ;;  %s1586_s25 = sphi %s1636_s25, %s2073_s25   ;;  %s1582_s24 = sphi %s1634_s24, %s2072_s24   ;;  %s1578_s23 = sphi %s1632_s23, %s2071_s23   ;;  %s1574_s22 = sphi %s1630_s22, %s2070_s22   ;;  %s1570_s21 = sphi %s1628_s21, %s2069_s21  }
   0x5   : > { %s39_s29 = sadd.s32 1, %s1586_s25  ;;  %s201_s30 = sadd.s32 1, %s1578_s23 }
   0x6   : > { %p41_p0 = scmp.ge.s32.totalorder %s39_s29, 2  ;;  %p211_p1 = scmp.ne.s32.totalorder %s1578_s23, %s1574_s22 }
   0x7   : > { %p212_p2 = scmp.eq.s32.totalorder %s1245_s27, 1  ;;  %p217_p3 = scmp.ne.s32.totalorder %s1574_s22, %s1570_s21 }
   0x8   : > { %s2075_s29 = smov (%p41_p0, %s39_s29), 0  ;;  %p218_p5 = scmp.eq.s32.totalorder %s1246_s28, 1 }
   0x9   : > { %p1668_p4 = por %p212_p2, %p211_p1  ;;  %s196_s8 = ssub.s32 %s1586_s25, %s2075_s29 }
   0xa   : > { %p1249_p6 = scmp.ge.s32.totalorder %s1590_s26, 1  ;;  %p199_p7 = scmp.eq.s32.totalorder %s196_s8, 0 }
   0xb   : > { %p1675_p8 = por %p218_p5, %p217_p3  ;;  %p275_p9 = scmp.lt.s32.totalorder %s1590_s26, 3 }
   0xc   : > { %s1681_s10 = scalar_select %p199_p7, %s1578_s23, %s201_s30  }
   0xd   : > { %p276_p10 = pnand %p1249_p6, %p275_p9 }
   0xe   : > { %p331_p11 = scmp.lt.s32.totalorder (!%p276_p10), %s1582_s24, 1  ;;  %s327_s14 = sand.u32 (!%p276_p10), 1, %s1574_s22  }
   0xf   : > { %279 = sbr.rel (%p276_p10) target bundleno = 330 (0x14a), region = 40  ;;  %s1112_s18 = scalar_lea.hbm (!%p276_p10), %s2066_s6, %s1582_s24 }
  0x10   : > { %s1116_s20 = sshll.u32 (!%p276_p10), %s1112_s18, 4  ;;  %s1098_s27 = scalar_lea.sflag (!%p276_p10), [#allocation3], %s327_s14  ;;  %s1117_s20 = int_to_ptr.hbm [resolvable:$true] %s1116_s20 }
  0x11   : > { %s1532_s11 = scalar_lea.hbm (!%p276_p10), %s2066_s6, 2 }
  0x14   : > { %v431_v0 = vld [vmem:[%s2063_s3] sm:$0x1]  ;;  %vm561_vm0 = vcmask 1040384   ;;  %s332_s15 = scalar_select %p331_p11, %s1582_s24, 1  ;;  %vm512_vm1 = vcmask 15360   ;;  %vm974_vm2 = vcmask 60416  }
  0x15   : > { %v398_v1 = vld [vmem:[%s2062_s2] sm:$0x1]  ;;  %v563_v2 = vsel %vm561_vm0, %v431_v0, 0  ;;  %vm1013_vm3 = vcmask 64512   ;;  %vm1011_vm4 = vcmask 57344  }
  0x16   : > { %v783_v3 = vsel %vm561_vm0, %v398_v1, 0  ;;  %572 = vmatpush.bf16.msra.mxu0 %v563_v2  ;;  %1453 = vmatpush.bf16.msra.mxu2 %v563_v2  ;;  %s1691_s16 = sshll.u32 %s332_s15, 7  ;;  %v1772_v36 = vld [vmem:[%s2064_s4] ss:$0 sm:$0xff]  ;;  %s1988_s15 = scalar_lea.vmem [#allocation2], %s327_s14 }
  0x17   : > { %792 = vmatpush.bf16.msra.mxu1 %v783_v3  ;;  %1454 = vmatpush.bf16.msra.mxu3 %v783_v3  ;;  %s1697_s19 = scalar_lea.vmem %s2061_s1, %s1691_s16  ;;  %s1703_s28 = scalar_lea.vmem %s2060_s0, %s1691_s16 }
  0x18   : > { %v1437_v4 = vld [vmem:[%s1697_s19] sm:$0xff]  ;;  %v1438_v8 = vld [vmem:[%s1697_s19 + $0x8] sm:$0xff]  ;;  %v1439_v12 = vld [vmem:[%s1697_s19 + $0x10] sm:$0xff]  ;;  %s1779_s13 = scalar_lea.vmem %s2065_s5, %s1691_s16 }
  0x19   : > { %v1421_v5 = vld [vmem:[%s1703_s28] sm:$0xff]  ;;  %1320 = vmatmul.msk.bf16.vlgmr.msra.gmra.mxu0 %vm512_vm1, %v1437_v4  ;;  %v1422_v9 = vld [vmem:[%s1703_s28 + $0x8] sm:$0xff]  ;;  %v1423_v13 = vld [vmem:[%s1703_s28 + $0x10] sm:$0xff] }
  0x1a   : > { %v1445_v6 = vld [vmem:[%s1697_s19 + $0x40] sm:$0xff]  ;;  %1400 = vmatmul.msk.bf16.vlgmr.msra.gmra.mxu1 %vm512_vm1, %v1421_v5  ;;  %v1446_v10 = vld [vmem:[%s1697_s19 + $0x48] sm:$0xff]  ;;  %v1447_v14 = vld [vmem:[%s1697_s19 + $0x50] sm:$0xff] }
  0x1b   : > { %v1429_v7 = vld [vmem:[%s1703_s28 + $0x40] sm:$0xff]  ;;  %1328 = vmatmul.msk.bf16.vlgmr.msra.gmra.mxu2 %vm512_vm1, %v1445_v6  ;;  %v1430_v11 = vld [vmem:[%s1703_s28 + $0x48] sm:$0xff]  ;;  %v1431_v15 = vld [vmem:[%s1703_s28 + $0x50] sm:$0xff] }
  0x1c   : > { %1408 = vmatmul.msk.bf16.vlgmr.msra.gmra.mxu3 %vm512_vm1, %v1429_v7  ;;  %v1440_v16 = vld [vmem:[%s1697_s19 + $0x18] sm:$0xff]  ;;  %v1441_v20 = vld [vmem:[%s1697_s19 + $0x20] sm:$0xff]  ;;  %v1442_v24 = vld [vmem:[%s1697_s19 + $0x28] sm:$0xff] }
  0x1d   : > { %v1424_v17 = vld [vmem:[%s1703_s28 + $0x18] sm:$0xff]  ;;  %v1425_v21 = vld [vmem:[%s1703_s28 + $0x20] sm:$0xff]  ;;  %v1426_v25 = vld [vmem:[%s1703_s28 + $0x28] sm:$0xff] }
  0x1e   : > { %v1448_v18 = vld [vmem:[%s1697_s19 + $0x58] sm:$0xff]  ;;  %v1449_v22 = vld [vmem:[%s1697_s19 + $0x60] sm:$0xff]  ;;  %v1450_v26 = vld [vmem:[%s1697_s19 + $0x68] sm:$0xff] }
  0x1f   : > { %v1432_v19 = vld [vmem:[%s1703_s28 + $0x58] sm:$0xff]  ;;  %v1433_v23 = vld [vmem:[%s1703_s28 + $0x60] sm:$0xff]  ;;  %v1434_v27 = vld [vmem:[%s1703_s28 + $0x68] sm:$0xff] }
  0x20   : > { %v1443_v28 = vld [vmem:[%s1697_s19 + $0x30] sm:$0xff]  ;;  %v1444_v32 = vld [vmem:[%s1697_s19 + $0x38] sm:$0xff] }
  0x21   : > { %v1427_v29 = vld [vmem:[%s1703_s28 + $0x30] sm:$0xff]  ;;  %v1428_v33 = vld [vmem:[%s1703_s28 + $0x38] sm:$0xff] }
  0x22   : > { %v1451_v30 = vld [vmem:[%s1697_s19 + $0x70] sm:$0xff]  ;;  %v1452_v34 = vld [vmem:[%s1697_s19 + $0x78] sm:$0xff]  ;;  %s1114_s19 = sshll.u32 %s1988_s15, 4  ;;  %s1115_s19 = int_to_ptr.vmem [resolvable:$true] %s1114_s19 }
  0x23   : > { %v1435_v31 = vld [vmem:[%s1703_s28 + $0x70] sm:$0xff]  ;;  %v1436_v35 = vld [vmem:[%s1703_s28 + $0x78] sm:$0xff]  ;;  %s1526_s28 = sshra.s32 %s1117_s20, 4  ;;  %s1527_s28 = int_to_ptr.hbm [resolvable:$true] %s1526_s28 }
  0x24   : > { %s1528_s30 = scalar_lea.hbm %s1527_s28, 1  ;;  %p1533_p1 = scmp.lt.s32.totalorder %s1527_s28, %s2066_s6 }
  0x25   : > { %p1529_p12 = scmp.ne.s32.totalorder %s1527_s28, %s1528_s30  ;;  %p1534_p2 = scmp.lt.s32.totalorder %s1532_s11, %s1528_s30 }
  0x27   : > { %p1530_p13 = pnand %p1529_p12, %p1668_p4  ;;  %p1535_p3 = por %p1534_p2, %p1533_p1 }
  0x29   : > { %1321 = vmatmul.msk.bf16.gmra.mxu0 %vm512_vm1, %v1438_v8  ;;  %p1531_p0 = pneg %p1530_p13 }
  0x2a   : > { %1401 = vmatmul.msk.bf16.gmra.mxu1 %vm512_vm1, %v1422_v9 }
  0x2b   : > { %1329 = vmatmul.msk.bf16.gmra.mxu2 %vm512_vm1, %v1446_v10  ;;  %p1536_p5 = pnand %p1535_p3, %p1531_p0 }
  0x2c   : > { %1409 = vmatmul.msk.bf16.gmra.mxu3 %vm512_vm1, %v1430_v11 }
  0x39   : > { %1322 = vmatmul.msk.bf16.gmra.mxu0 %vm512_vm1, %v1439_v12 }
  0x3a   : > { %1402 = vmatmul.msk.bf16.gmra.mxu1 %vm512_vm1, %v1423_v13 }
  0x3b   : > { %1330 = vmatmul.msk.bf16.gmra.mxu2 %vm512_vm1, %v1447_v14 }
  0x3c   : > { %1410 = vmatmul.msk.bf16.gmra.mxu3 %vm512_vm1, %v1431_v15 }
  0x49   : > { %1323 = vmatmul.msk.bf16.gmra.mxu0 %vm512_vm1, %v1440_v16 }
  0x4a   : > { %1403 = vmatmul.msk.bf16.gmra.mxu1 %vm512_vm1, %v1424_v17 }
  0x4b   : > { %1331 = vmatmul.msk.bf16.gmra.mxu2 %vm512_vm1, %v1448_v18 }
  0x4c   : > { %1411 = vmatmul.msk.bf16.gmra.mxu3 %vm512_vm1, %v1432_v19 }
  0x59   : > { %1324 = vmatmul.msk.bf16.gmra.mxu0 %vm512_vm1, %v1441_v20 }
  0x5a   : > { %1404 = vmatmul.msk.bf16.gmra.mxu1 %vm512_vm1, %v1425_v21 }
  0x5b   : > { %1332 = vmatmul.msk.bf16.gmra.mxu2 %vm512_vm1, %v1449_v22 }
  0x5c   : > { %1412 = vmatmul.msk.bf16.gmra.mxu3 %vm512_vm1, %v1433_v23 }
  0x69   : > { %1325 = vmatmul.msk.bf16.gmra.mxu0 %vm512_vm1, %v1442_v24 }
  0x6a   : > { %1405 = vmatmul.msk.bf16.gmra.mxu1 %vm512_vm1, %v1426_v25 }
  0x6b   : > { %1333 = vmatmul.msk.bf16.gmra.mxu2 %vm512_vm1, %v1450_v26 }
  0x6c   : > { %1413 = vmatmul.msk.bf16.gmra.mxu3 %vm512_vm1, %v1434_v27 }
  0x79   : > { %1326 = vmatmul.msk.bf16.gmra.mxu0 %vm512_vm1, %v1443_v28 }
  0x7a   : > { %1406 = vmatmul.msk.bf16.gmra.mxu1 %vm512_vm1, %v1427_v29 }
  0x7b   : > { %1334 = vmatmul.msk.bf16.gmra.mxu2 %vm512_vm1, %v1451_v30 }
  0x7c   : > { %1414 = vmatmul.msk.bf16.gmra.mxu3 %vm512_vm1, %v1435_v31 }
  0x89   : > { %1327 = vmatmul.msk.bf16.gmra.mxu0 %vm512_vm1, %v1444_v32 }
  0x8a   : > { %1407 = vmatmul.msk.bf16.gmra.mxu1 %vm512_vm1, %v1428_v33 }
  0x8b   : > { %1335 = vmatmul.msk.bf16.gmra.mxu2 %vm512_vm1, %v1452_v34 }
  0x8c   : > { %1415 = vmatmul.msk.bf16.gmra.mxu3 %vm512_vm1, %v1436_v35 }
  0x96   : > { %v574_v37 = vpop.f32.mrf.mxu0 }
  0x97   : > { %v794_v38 = vpop.f32.mrf.mxu1 }
  0x98   : > { %v795_v39 = vadd.f32 %v794_v38, %v574_v37 }
  0x9a   : > { %v878_v40 = vadd.f32 %v1772_v36, %v795_v39 }
  0x9c   : > { %v910_v41 = vmax.f32 %v878_v40, 0.0 }
  0x9e   : > { %v942_v42 = vpack.c.bf16 %v910_v41, %v910_v41  ;;  %v614_v43 = vpop.f32.mrf.mxu2  ;;  %v576_v45 = vpop.f32.mrf.mxu0  ;;  %v1014_v54 = vsel %vm1013_vm3, %v910_v41, 0.0 }
  0x9f   : > { %v834_v44 = vpop.f32.mrf.mxu3  ;;  %v796_v46 = vpop.f32.mrf.mxu1 }
  0xa0   : > { %v835_v47 = vadd.f32 %v834_v44, %v614_v43  ;;  %975 = vst.msk [vmem:[%s1779_s13] sm:$0xf] %vm974_vm2, %v942_v42  ;;  %v797_v48 = vadd.f32 %v796_v46, %v576_v45 }
  0xa2   : > { %v894_v49 = vadd.f32 %v1772_v36, %v835_v47  ;;  %v879_v50 = vadd.f32 %v1772_v36, %v797_v48 }
  0xa4   : > { %v1785_v51 = vmax.f32 %v894_v49, 0.0  ;;  %v911_v52 = vmax.f32 %v879_v50, 0.0 }
  0xa6   : > { %v958_v53 = vpack.c.bf16 %v1785_v51, %v1785_v51  ;;  %v943_v55 = vpack.c.bf16 %v911_v52, %v911_v52  ;;  %v1015_v56 = vsel %vm1013_vm3, %v911_v52, 0.0  ;;  %v616_v57 = vpop.f32.mrf.mxu2  ;;  %v579_v60 = vpop.f32.mrf.mxu0 }
  0xa7   : > { %v836_v58 = vpop.f32.mrf.mxu3  ;;  %v1016_v59 = vadd.f32 %v1015_v56, %v1014_v54  ;;  %v799_v61 = vpop.f32.mrf.mxu1 }
  0xa8   : > { %991 = vst.msk [vmem:[%s1779_s13 + $0x40] sm:$0xf] %vm974_vm2, %v958_v53  ;;  %v837_v62 = vadd.f32 %v836_v58, %v616_v57  ;;  %v800_v63 = vadd.f32 %v799_v61, %v579_v60 }
  0xa9   : > { %976 = vst.msk [vmem:[%s1779_s13 + $0x4] sm:$0xf] %vm974_vm2, %v943_v55 }
  0xaa   : > { %v895_v0 = vadd.f32 %v1772_v36, %v837_v62  ;;  %v880_v1 = vadd.f32 %v1772_v36, %v800_v63 }
  0xac   : > { %v1797_v2 = vmax.f32 %v895_v0, 0.0  ;;  %v912_v3 = vmax.f32 %v880_v1, 0.0 }
  0xae   : > { %v959_v4 = vpack.c.bf16 %v1797_v2, %v1797_v2  ;;  %v944_v5 = vpack.c.bf16 %v912_v3, %v912_v3  ;;  %v1017_v6 = vsel %vm1013_vm3, %v912_v3, 0.0  ;;  %v619_v7 = vpop.f32.mrf.mxu2  ;;  %v581_v10 = vpop.f32.mrf.mxu0 }
  0xaf   : > { %v839_v8 = vpop.f32.mrf.mxu3  ;;  %v1018_v9 = vadd.f32 %v1017_v6, %v1016_v59  ;;  %v801_v11 = vpop.f32.mrf.mxu1 }
  0xb0   : > { %992 = vst.msk [vmem:[%s1779_s13 + $0x44] sm:$0xf] %vm974_vm2, %v959_v4  ;;  %v840_v12 = vadd.f32 %v839_v8, %v619_v7  ;;  %v802_v13 = vadd.f32 %v801_v11, %v581_v10 }
  0xb1   : > { %977 = vst.msk [vmem:[%s1779_s13 + $0x8] sm:$0xf] %vm974_vm2, %v944_v5 }
  0xb2   : > { %v896_v14 = vadd.f32 %v1772_v36, %v840_v12  ;;  %v881_v15 = vadd.f32 %v1772_v36, %v802_v13 }
  0xb4   : > { %v1808_v16 = vmax.f32 %v896_v14, 0.0  ;;  %v913_v17 = vmax.f32 %v881_v15, 0.0 }
  0xb6   : > { %v960_v18 = vpack.c.bf16 %v1808_v16, %v1808_v16  ;;  %v945_v19 = vpack.c.bf16 %v913_v17, %v913_v17  ;;  %v1019_v20 = vsel %vm1013_vm3, %v913_v17, 0.0  ;;  %v621_v21 = vpop.f32.mrf.mxu2  ;;  %v584_v24 = vpop.f32.mrf.mxu0 }
  0xb7   : > { %v841_v22 = vpop.f32.mrf.mxu3  ;;  %v1020_v23 = vadd.f32 %v1019_v20, %v1018_v9  ;;  %v804_v25 = vpop.f32.mrf.mxu1 }
  0xb8   : > { %993 = vst.msk [vmem:[%s1779_s13 + $0x48] sm:$0xf] %vm974_vm2, %v960_v18  ;;  %v842_v26 = vadd.f32 %v841_v22, %v621_v21  ;;  %v805_v27 = vadd.f32 %v804_v25, %v584_v24 }
  0xb9   : > { %978 = vst.msk [vmem:[%s1779_s13 + $0xc] sm:$0xf] %vm974_vm2, %v945_v19 }
  0xba   : > { %v897_v28 = vadd.f32 %v1772_v36, %v842_v26  ;;  %v882_v29 = vadd.f32 %v1772_v36, %v805_v27 }
  0xbc   : > { %v1819_v30 = vmax.f32 %v897_v28, 0.0  ;;  %v914_v31 = vmax.f32 %v882_v29, 0.0 }
  0xbe   : > { %v961_v32 = vpack.c.bf16 %v1819_v30, %v1819_v30  ;;  %v946_v33 = vpack.c.bf16 %v914_v31, %v914_v31  ;;  %v1021_v34 = vsel %vm1013_vm3, %v914_v31, 0.0  ;;  %v624_v35 = vpop.f32.mrf.mxu2  ;;  %v586_v39 = vpop.f32.mrf.mxu0 }
  0xbf   : > { %v844_v37 = vpop.f32.mrf.mxu3  ;;  %v1824_v38 = vadd.f32 %v1021_v34, %v1020_v23  ;;  %v806_v40 = vpop.f32.mrf.mxu1 }
  0xc0   : > { %994 = vst.msk [vmem:[%s1779_s13 + $0x4c] sm:$0xf] %vm974_vm2, %v961_v32  ;;  %v845_v41 = vadd.f32 %v844_v37, %v624_v35  ;;  %v807_v42 = vadd.f32 %v806_v40, %v586_v39 }
  0xc1   : > { %979 = vst.msk [vmem:[%s1779_s13 + $0x10] sm:$0xf] %vm974_vm2, %v946_v33 }
  0xc2   : > { %v898_v43 = vadd.f32 %v1772_v36, %v845_v41  ;;  %v883_v44 = vadd.f32 %v1772_v36, %v807_v42 }
  0xc4   : > { %v1832_v45 = vmax.f32 %v898_v43, 0.0  ;;  %v1834_v46 = vmax.f32 %v883_v44, 0.0 }
  0xc6   : > { %v962_v47 = vpack.c.bf16 %v1832_v45, %v1832_v45  ;;  %v947_v48 = vpack.c.bf16 %v1834_v46, %v1834_v46  ;;  %v626_v49 = vpop.f32.mrf.mxu2  ;;  %v589_v52 = vpop.f32.mrf.mxu0 }
  0xc7   : > { %v846_v50 = vpop.f32.mrf.mxu3  ;;  %v809_v53 = vpop.f32.mrf.mxu1 }
  0xc8   : > { %995 = vst.msk [vmem:[%s1779_s13 + $0x50] sm:$0xf] %vm974_vm2, %v962_v47  ;;  %v847_v54 = vadd.f32 %v846_v50, %v626_v49  ;;  %v810_v55 = vadd.f32 %v809_v53, %v589_v52 }
  0xc9   : > { %980 = vst.msk [vmem:[%s1779_s13 + $0x14] sm:$0xf] %vm974_vm2, %v947_v48 }
  0xca   : > { %v899_v56 = vadd.f32 %v1772_v36, %v847_v54  ;;  %v884_v57 = vadd.f32 %v1772_v36, %v810_v55 }
  0xcc   : > { %v1846_v58 = vmax.f32 %v899_v56, 0.0  ;;  %v1848_v59 = vmax.f32 %v884_v57, 0.0 }
  0xce   : > { %v963_v60 = vpack.c.bf16 %v1846_v58, %v1846_v58  ;;  %v948_v61 = vpack.c.bf16 %v1848_v59, %v1848_v59  ;;  %v629_v62 = vpop.f32.mrf.mxu2  ;;  %v591_v0 = vpop.f32.mrf.mxu0 }
  0xcf   : > { %v849_v63 = vpop.f32.mrf.mxu3  ;;  %v811_v1 = vpop.f32.mrf.mxu1 }
  0xd0   : > { %996 = vst.msk [vmem:[%s1779_s13 + $0x54] sm:$0xf] %vm974_vm2, %v963_v60  ;;  %v850_v3 = vadd.f32 %v849_v63, %v629_v62  ;;  %v812_v4 = vadd.f32 %v811_v1, %v591_v0 }
  0xd1   : > { %981 = vst.msk [vmem:[%s1779_s13 + $0x18] sm:$0xf] %vm974_vm2, %v948_v61 }
  0xd2   : > { %v900_v5 = vadd.f32 %v1772_v36, %v850_v3  ;;  %v885_v6 = vadd.f32 %v1772_v36, %v812_v4 }
  0xd4   : > { %v1860_v7 = vmax.f32 %v900_v5, 0.0  ;;  %v1862_v8 = vmax.f32 %v885_v6, 0.0 }
  0xd6   : > { %v964_v9 = vpack.c.bf16 %v1860_v7, %v1860_v7  ;;  %v949_v10 = vpack.c.bf16 %v1862_v8, %v1862_v8  ;;  %v631_v11 = vpop.f32.mrf.mxu2  ;;  %v594_v13 = vpop.f32.mrf.mxu0 }
  0xd7   : > { %v851_v12 = vpop.f32.mrf.mxu3  ;;  %v814_v14 = vpop.f32.mrf.mxu1 }
  0xd8   : > { %997 = vst.msk [vmem:[%s1779_s13 + $0x58] sm:$0xf] %vm974_vm2, %v964_v9  ;;  %v852_v15 = vadd.f32 %v851_v12, %v631_v11  ;;  %v815_v17 = vadd.f32 %v814_v14, %v594_v13 }
  0xd9   : > { %982 = vst.msk [vmem:[%s1779_s13 + $0x1c] sm:$0xf] %vm974_vm2, %v949_v10 }
  0xda   : > { %v901_v18 = vadd.f32 %v1772_v36, %v852_v15  ;;  %v886_v19 = vadd.f32 %v1772_v36, %v815_v17 }
  0xdc   : > { %v1874_v20 = vmax.f32 %v901_v18, 0.0  ;;  %v1876_v21 = vmax.f32 %v886_v19, 0.0 }
  0xde   : > { %v965_v22 = vpack.c.bf16 %v1874_v20, %v1874_v20  ;;  %v950_v23 = vpack.c.bf16 %v1876_v21, %v1876_v21  ;;  %v634_v24 = vpop.f32.mrf.mxu2  ;;  %v596_v26 = vpop.f32.mrf.mxu0 }
  0xdf   : > { %v854_v25 = vpop.f32.mrf.mxu3  ;;  %v816_v27 = vpop.f32.mrf.mxu1 }
  0xe0   : > { %998 = vst.msk [vmem:[%s1779_s13 + $0x5c] sm:$0xf] %vm974_vm2, %v965_v22  ;;  %v855_v28 = vadd.f32 %v854_v25, %v634_v24  ;;  %v817_v29 = vadd.f32 %v816_v27, %v596_v26  ;;  %v1023_v27 = vsel %vm1013_vm3, %v1834_v46, 0.0 }
  0xe1   : > { %983 = vst.msk [vmem:[%s1779_s13 + $0x20] sm:$0xf] %vm974_vm2, %v950_v23 }
  0xe2   : > { %v902_v31 = vadd.f32 %v1772_v36, %v855_v28  ;;  %v887_v32 = vadd.f32 %v1772_v36, %v817_v29 }
  0xe4   : > { %v1888_v33 = vmax.f32 %v902_v31, 0.0  ;;  %v1890_v34 = vmax.f32 %v887_v32, 0.0  ;;  %v1025_v31 = vsel %vm1013_vm3, %v1848_v59, 0.0 }
  0xe6   : > { %v966_v35 = vpack.c.bf16 %v1888_v33, %v1888_v33  ;;  %v951_v37 = vpack.c.bf16 %v1890_v34, %v1890_v34  ;;  %v636_v39 = vpop.f32.mrf.mxu2  ;;  %v599_v41 = vpop.f32.mrf.mxu0 }
  0xe7   : > { %v856_v40 = vpop.f32.mrf.mxu3  ;;  %v819_v42 = vpop.f32.mrf.mxu1 }
  0xe8   : > { %999 = vst.msk [vmem:[%s1779_s13 + $0x60] sm:$0xf] %vm974_vm2, %v966_v35  ;;  %v857_v43 = vadd.f32 %v856_v40, %v636_v39  ;;  %v820_v44 = vadd.f32 %v819_v42, %v599_v41  ;;  %v1024_v35 = vadd.f32 %v1023_v27, %v1824_v38  ;;  %v1027_v39 = vsel %vm1013_vm3, %v1862_v8, 0.0 }
  0xe9   : > { %984 = vst.msk [vmem:[%s1779_s13 + $0x24] sm:$0xf] %vm974_vm2, %v951_v37  ;;  %v1029_v42 = vsel %vm1013_vm3, %v1876_v21, 0.0  ;;  %v1031_v8 = vsel %vm1013_vm3, %v1890_v34, 0.0 }
  0xea   : > { %v903_v47 = vadd.f32 %v1772_v36, %v857_v43  ;;  %v888_v48 = vadd.f32 %v1772_v36, %v820_v44  ;;  %v1026_v40 = vadd.f32 %v1025_v31, %v1024_v35  ;;  %v1045_v35 = vsel %vm1013_vm3, %v1785_v51, 0.0 }
  0xeb   : > { %v1592_v51 = vmov 0.0  }
  0xec   : > { %v1902_v49 = vmax.f32 %v903_v47, 0.0  ;;  %v1904_v50 = vmax.f32 %v888_v48, 0.0  ;;  %v1028_v47 = vadd.f32 %v1027_v39, %v1026_v40  ;;  %v1047_v40 = vsel %vm1013_vm3, %v1797_v2, 0.0  ;;  %1012 = vst.msk [vmem:[%s1988_s15] sm:$0x1] %vm1011_vm4, %v1592_v51 }
  0xed   : > { %v1053_v2 = vsel %vm1013_vm3, %v1832_v45, 0.0 }
  0xee   : > { %v967_v52 = vpack.c.bf16 %v1902_v49, %v1902_v49  ;;  %v952_v53 = vpack.c.bf16 %v1904_v50, %v1904_v50  ;;  %v639_v54 = vpop.f32.mrf.mxu2  ;;  %v601_v56 = vpop.f32.mrf.mxu0  ;;  %v1033_v21 = vsel %vm1013_vm3, %v1904_v50, 0.0  ;;  %v1063_v45 = vsel %vm1013_vm3, %v1902_v49, 0.0 }
  0xef   : > { %v859_v55 = vpop.f32.mrf.mxu3  ;;  %v821_v57 = vpop.f32.mrf.mxu1 }
  0xf0   : > { %1000 = vst.msk [vmem:[%s1779_s13 + $0x64] sm:$0xf] %vm974_vm2, %v967_v52  ;;  %v860_v60 = vadd.f32 %v859_v55, %v639_v54  ;;  %v822_v61 = vadd.f32 %v821_v57, %v601_v56  ;;  %v1030_v54 = vadd.f32 %v1029_v42, %v1028_v47 }
  0xf1   : > { %985 = vst.msk [vmem:[%s1779_s13 + $0x28] sm:$0xf] %vm974_vm2, %v952_v53 }
  0xf2   : > { %v904_v62 = vadd.f32 %v1772_v36, %v860_v60  ;;  %v889_v63 = vadd.f32 %v1772_v36, %v822_v61  ;;  %v1032_v57 = vadd.f32 %v1031_v8, %v1030_v54 }
  0xf4   : > { %v1916_v0 = vmax.f32 %v904_v62, 0.0  ;;  %v921_v1 = vmax.f32 %v889_v63, 0.0  ;;  %v1034_v34 = vadd.f32 %v1033_v21, %v1032_v57 }
  0xf6   : > { %v968_v3 = vpack.c.bf16 %v1916_v0, %v1916_v0  ;;  %v953_v4 = vpack.c.bf16 %v921_v1, %v921_v1  ;;  %v641_v5 = vpop.f32.mrf.mxu2  ;;  %v604_v9 = vpop.f32.mrf.mxu0  ;;  %v1035_v61 = vsel %vm1013_vm3, %v921_v1, 0.0 }
  0xf7   : > { %v861_v6 = vpop.f32.mrf.mxu3  ;;  %v824_v10 = vpop.f32.mrf.mxu1 }
  0xf8   : > { %1001 = vst.msk [vmem:[%s1779_s13 + $0x68] sm:$0xf] %vm974_vm2, %v968_v3  ;;  %v862_v11 = vadd.f32 %v861_v6, %v641_v5  ;;  %v825_v12 = vadd.f32 %v824_v10, %v604_v9  ;;  %v1036_v9 = vadd.f32 %v1035_v61, %v1034_v34 }
  0xf9   : > { %986 = vst.msk [vmem:[%s1779_s13 + $0x2c] sm:$0xf] %vm974_vm2, %v953_v4 }
  0xfa   : > { %v905_v13 = vadd.f32 %v1772_v36, %v862_v11  ;;  %v890_v14 = vadd.f32 %v1772_v36, %v825_v12 }
  0xfc   : > { %v1926_v15 = vmax.f32 %v905_v13, 0.0  ;;  %v922_v17 = vmax.f32 %v890_v14, 0.0 }
  0xfe   : > { %v969_v18 = vpack.c.bf16 %v1926_v15, %v1926_v15  ;;  %v954_v19 = vpack.c.bf16 %v922_v17, %v922_v17  ;;  %v644_v22 = vpop.f32.mrf.mxu2  ;;  %v606_v24 = vpop.f32.mrf.mxu0  ;;  %v1037_v3 = vsel %vm1013_vm3, %v922_v17, 0.0 }
  0xff   : > { %v864_v23 = vpop.f32.mrf.mxu3  ;;  %v826_v25 = vpop.f32.mrf.mxu1  ;;  %v1038_v13 = vadd.f32 %v1037_v3, %v1036_v9 }
 0x100   : > { %1002 = vst.msk [vmem:[%s1779_s13 + $0x6c] sm:$0xf] %vm974_vm2, %v969_v18  ;;  %v865_v26 = vadd.f32 %v864_v23, %v644_v22  ;;  %v827_v28 = vadd.f32 %v826_v25, %v606_v24 }
 0x101   : > { %987 = vst.msk [vmem:[%s1779_s13 + $0x30] sm:$0xf] %vm974_vm2, %v954_v19 }
 0x102   : > { %v906_v29 = vadd.f32 %v1772_v36, %v865_v26  ;;  %v891_v32 = vadd.f32 %v1772_v36, %v827_v28 }
 0x104   : > { %v1941_v37 = vmax.f32 %v906_v29, 0.0  ;;  %v923_v46 = vmax.f32 %v891_v32, 0.0 }
 0x106   : > { %v970_v41 = vpack.c.bf16 %v1941_v37, %v1941_v37  ;;  %v955_v43 = vpack.c.bf16 %v923_v46, %v923_v46  ;;  %v646_v59 = vpop.f32.mrf.mxu2  ;;  %v609_v48 = vpop.f32.mrf.mxu0  ;;  %v1039_v12 = vsel %vm1013_vm3, %v923_v46, 0.0 }
 0x107   : > { %v866_v44 = vpop.f32.mrf.mxu3  ;;  %v829_v38 = vpop.f32.mrf.mxu1  ;;  %v1040_v19 = vadd.f32 %v1039_v12, %v1038_v13 }
 0x108   : > { %1003 = vst.msk [vmem:[%s1779_s13 + $0x70] sm:$0xf] %vm974_vm2, %v970_v41  ;;  %v867_v52 = vadd.f32 %v866_v44, %v646_v59  ;;  %v830_v53 = vadd.f32 %v829_v38, %v609_v48  ;;  %v1055_v48 = vsel %vm1013_vm3, %v1846_v58, 0.0  ;;  %v1065_v58 = vsel %vm1013_vm3, %v1916_v0, 0.0 }
 0x109   : > { %988 = vst.msk [vmem:[%s1779_s13 + $0x34] sm:$0xf] %vm974_vm2, %v955_v43  ;;  %v1049_v43 = vsel %vm1013_vm3, %v1808_v16, 0.0 }
 0x10a   : > { %v907_v55 = vadd.f32 %v1772_v36, %v867_v52  ;;  %v892_v56 = vadd.f32 %v1772_v36, %v830_v53  ;;  %v1057_v52 = vsel %vm1013_vm3, %v1860_v7, 0.0  ;;  %v1059_v53 = vsel %vm1013_vm3, %v1874_v20, 0.0 }
 0x10b   : > { %v1067_v7 = vsel %vm1013_vm3, %v1926_v15, 0.0  ;;  %v1069_v20 = vsel %vm1013_vm3, %v1941_v37, 0.0 }
 0x10c   : > { %v1959_v60 = vmax.f32 %v907_v55, 0.0  ;;  %v924_v62 = vmax.f32 %v892_v56, 0.0 }
 0x10e   : > { %v971_v63 = vpack.c.bf16 %v1959_v60, %v1959_v60  ;;  %v956_v4 = vpack.c.bf16 %v924_v62, %v924_v62  ;;  %v649_v5 = vpop.f32.mrf.mxu2  ;;  %v611_v50 = vpop.f32.mrf.mxu0  ;;  %v1041_v17 = vsel %vm1013_vm3, %v924_v62, 0.0  ;;  %v1071_v61 = vsel %vm1013_vm3, %v1959_v60, 0.0  ;;  %v1083_v60 = vld [vmem:[%s1988_s15] sm:$0x1] }
 0x10f   : > { %v869_v6 = vpop.f32.mrf.mxu3  ;;  %v831_v10 = vpop.f32.mrf.mxu1  ;;  %v1042_v24 = vadd.f32 %v1041_v17, %v1040_v19 }
 0x110   : > { %1004 = vst.msk [vmem:[%s1779_s13 + $0x74] sm:$0xf] %vm974_vm2, %v971_v63  ;;  %v870_v11 = vadd.f32 %v869_v6, %v649_v5  ;;  %v832_v1 = vadd.f32 %v831_v10, %v611_v50 }
 0x111   : > { %989 = vst.msk [vmem:[%s1779_s13 + $0x38] sm:$0xf] %vm974_vm2, %v956_v4 }
 0x112   : > { %v908_v14 = vadd.f32 %v1772_v36, %v870_v11  ;;  %v893_v18 = vadd.f32 %v1772_v36, %v832_v1 }
 0x114   : > { %v940_v22 = vmax.f32 %v908_v14, 0.0  ;;  %v925_v23 = vmax.f32 %v893_v18, 0.0 }
 0x116   : > { %v972_v25 = vpack.c.bf16 %v940_v22, %v940_v22  ;;  %v957_v26 = vpack.c.bf16 %v925_v23, %v925_v23  ;;  %v1043_v27 = vsel %vm1013_vm3, %v925_v23, 0.0  ;;  %v651_v28 = vpop.f32.mrf.mxu2  ;;  %v1073_v62 = vsel %vm1013_vm3, %v940_v22, 0.0 }
 0x117   : > { %v871_v29 = vpop.f32.mrf.mxu3  ;;  %v1044_v31 = vadd.f32 %v1043_v27, %v1042_v24 }
 0x118   : > { %1005 = vst.msk [vmem:[%s1779_s13 + $0x78] sm:$0xf] %vm974_vm2, %v972_v25  ;;  %v872_v32 = vadd.f32 %v871_v29, %v651_v28 }
 0x119   : > { %990 = vst.msk [vmem:[%s1779_s13 + $0x3c] sm:$0xf] %vm974_vm2, %v957_v26  ;;  %v1046_v39 = vadd.f32 %v1045_v35, %v1044_v31 }
 0x11a   : > { %v909_v46 = vadd.f32 %v1772_v36, %v872_v32  ;;  %v1051_v36 = vsel %vm1013_vm3, %v1819_v30, 0.0  ;;  %v1061_v30 = vsel %vm1013_vm3, %v1888_v33, 0.0 }
 0x11b   : > { %v1048_v41 = vadd.f32 %v1047_v40, %v1046_v39 }
 0x11c   : > { %v941_v42 = vmax.f32 %v909_v46, 0.0 }
 0x11d   : > { %v1050_v59 = vadd.f32 %v1049_v43, %v1048_v41 }
 0x11e   : > { %v973_v44 = vpack.c.bf16 %v941_v42, %v941_v42  ;;  %v1075_v0 = vsel %vm1013_vm3, %v941_v42, 0.0 }
 0x11f   : > { %v1052_v47 = vadd.f32 %v1051_v36, %v1050_v59 }
 0x120   : > { %1006 = vst.msk [vmem:[%s1779_s13 + $0x7c] sm:$0xf] %vm974_vm2, %v973_v44 }
 0x121   : > { %v1054_v16 = vadd.f32 %v1053_v2, %v1052_v47 }
 0x123   : > { %v1056_v38 = vadd.f32 %v1055_v48, %v1054_v16 }
 0x125   : > { %v1058_v8 = vadd.f32 %v1057_v52, %v1056_v38 }
 0x127   : > { %v1060_v54 = vadd.f32 %v1059_v53, %v1058_v8 }
 0x129   : > { %v1062_v55 = vadd.f32 %v1061_v30, %v1060_v54 }
 0x12b   : > { %v1064_v21 = vadd.f32 %v1063_v45, %v1062_v55 }
 0x12d   : > { %v1066_v56 = vadd.f32 %v1065_v58, %v1064_v21 }
 0x12f   : > { %v1068_v57 = vadd.f32 %v1067_v7, %v1066_v56 }
 0x131   : > { %v1070_v33 = vadd.f32 %v1069_v20, %v1068_v57 }
 0x133   : > { %v1072_v49 = vadd.f32 %v1071_v61, %v1070_v33 }
 0x135   : > { %v1074_v34 = vadd.f32 %v1073_v62, %v1072_v49 }
 0x137   : > { %v1076_v63 = vadd.f32 %v1075_v0, %v1074_v34 }
 0x139   : > { %v1077_v15 = vrot.slane %v1076_v63, 4 }
 0x13b   : > { %v1078_v3 = vadd.f32 %v1077_v15, %v1076_v63 }
 0x13d   : > { %v1079_v4 = vrot.slane %v1078_v3, 2 }
 0x13f   : > { %v1080_v5 = vadd.f32 %v1079_v4, %v1078_v3 }
 0x141   : > { %v1081_v37 = vrot.slane %v1080_v5, 1 }
 0x143   : > { %v1082_v6 = vadd.f32 %v1081_v37, %v1080_v5 }
 0x145   : > { %v1084_v9 = vadd.f32 %v1083_v60, %v1082_v6 }
 0x147   : > { %1086 = vst.msk [vmem:[%s1988_s15] sm:$0x1] %vm1011_vm4, %v1084_v9 }
 0x148   : > { %1539 = shalt.err (!%p1536_p5)
}
 0x149   : > { %1455 = dma.vmem_to_hbm [thread:$0]  (%p1668_p4), %s1115_s19, 16, %s1117_s20, %s1098_s27  }
 0x14a PF: > { %p1461_p6 = scmp.ge.s32.totalorder %s1590_s26, 2  ;;  %s1141_s14 = sand.u32 1, %s1570_s21  }
 0x14b   : > { %s1142_s15 = scalar_lea.sflag [#allocation3], %s1141_s14 }
 0x14c   : > { %p1458_p7 = pnand %p1461_p6, %p1675_p8 }
 0x14e   : > { %p1459_p9 = pneg %p1458_p7 }
 0x150   : > { %1565 = dma.done.wait (%p1459_p9), %s1142_s15, 16  }
 0x151   : > { %1567 = vsyncadd (%p1459_p9), %s1142_s15, 4294967280  ;;  %s20_s26 = sadd.s32 1, %s1590_s26   ;;  %s2069_s21 = smov %s1574_s22 }
 0x152   : > { %p17_p10 = scmp.ge.s32.totalorder %s20_s26, 4   ;;  %s2070_s22 = smov %s1578_s23 }
 0x153   : > { %s2071_s23 = smov %s1681_s10  ;;  %s2072_s24 = smov %s1586_s25 }
 0x154   : > { %s2073_s25 = smov %s2075_s29  ;;  %19 = sbr.rel (!%p17_p10) target bundleno = 4 (0x4), region = 94 }
 0x159   :  { %1147 = vsyncpa [#allocation3], 1 }
 0x15a   :  { %1149 = vsyncpa [#allocation3 + $0x1], 1 }

</bundles_post_ra>
